<compile_context>
chip_gen: v7x
topology: tpu7x:2x2x1
jax: 0.10.0
libtpu: 0.0.40
codegen_flags: <defaults>
</compile_context>

<pallas_src>
import jax
import jax.numpy as jnp
from jax import lax
from jax.experimental import pallas as pl
from jax.experimental.pallas import tpu as pltpu

EPS = 1e-5


def _round_up(x, m):
    return ((x + m - 1) // m) * m


def _choose_tile_rows(n_rows, hidden, itemsize, vmem_budget_bytes=24 << 20):
    """Largest row tile (multiple of 32, <=1024) whose double-buffered
    in+out tiles fit the VMEM budget. Conservative enough for v7x (64 MiB)."""
    # 2 arrays (in + out) * 2 buffers each; budget in the wider of I/O dtype
    # vs. f32 compute temporaries.
    bytes_per_row = 4 * hidden * max(int(itemsize), 4)
    max_rows = max(32, vmem_budget_bytes // bytes_per_row)
    tile = min(1024, max_rows)
    tile = max(32, (tile // 32) * 32)
    # Don't tile larger than the (row-padded) problem itself.
    tile = min(tile, _round_up(n_rows, 32))
    return tile


def _layer_norm_kernel(x_ref, w_ref, b_ref, o_ref):
    # x_ref: (TILE_ROWS, H) tile in VMEM; w_ref/b_ref: (1, H) VMEM-resident
    # (untiled) affine parameters.
    x = x_ref[...].astype(jnp.float32)
    h = x.shape[-1]
    inv_h = jnp.float32(1.0 / h)

    # Fused single sweep: sum(x) and sum(x*x).
    s1 = jnp.sum(x, axis=-1, keepdims=True)
    s2 = jnp.sum(x * x, axis=-1, keepdims=True)
    mean = s1 * inv_h
    var = jnp.maximum(s2 * inv_h - mean * mean, 0.0)
    inv = lax.rsqrt(var + EPS)

    w = w_ref[...].astype(jnp.float32)
    b = b_ref[...].astype(jnp.float32)
    o_ref[...] = ((x - mean) * inv * w + b).astype(o_ref.dtype)


def layer_norm(x, weight, bias, *, tile_rows=None):
    """LayerNorm over the last axis of x. x: [..., H]; weight/bias: [H]."""
    orig_shape = x.shape
    H = orig_shape[-1]
    # TODO(synk): for production shapes with H < 128, fold rows into the lane
    # axis in this wrapper to keep stores lane-dense (avoid masked vst).
    x2 = x.reshape(-1, H)
    N = x2.shape[0]
    itemsize = jnp.dtype(x.dtype).itemsize

    if tile_rows is None:
        tile_rows = _choose_tile_rows(N, H, itemsize)

    n_pad = _round_up(N, tile_rows)
    if n_pad != N:
        x2 = jnp.pad(x2, ((0, n_pad - N), (0, 0)))

    w2 = weight.reshape(1, H)
    b2 = bias.reshape(1, H)

    grid = (n_pad // tile_rows,)

    cost = pl.CostEstimate(
        flops=8 * n_pad * H,
        transcendentals=n_pad,
        bytes_accessed=2 * n_pad * H * itemsize + 2 * H * jnp.dtype(weight.dtype).itemsize,
    )

    out = pl.pallas_call(
        _layer_norm_kernel,
        out_shape=jax.ShapeDtypeStruct((n_pad, H), x.dtype),
        grid_spec=pltpu.PrefetchScalarGridSpec(
            num_scalar_prefetch=0,
            grid=grid,
            in_specs=[
                pl.BlockSpec((tile_rows, H), lambda i: (i, 0)),
                # weight / bias: resident in VMEM once, not part of the
                # per-step pipeline.
                pl.BlockSpec(memory_space=pltpu.MemorySpace.VMEM),
                pl.BlockSpec(memory_space=pltpu.MemorySpace.VMEM),
            ],
            out_specs=pl.BlockSpec((tile_rows, H), lambda i: (i, 0)),
        ),
        compiler_params=pltpu.CompilerParams(
            dimension_semantics=("parallel",),
            vmem_limit_bytes=48 << 20,
        ),
        cost_estimate=cost,
    )(x2, w2, b2)

    if n_pad != N:
        out = out[:N]
    return out.reshape(orig_shape)


if __name__ == "__main__":
    B, S, H = 2, 8, 128
    key = jax.random.PRNGKey(0)
    kx, kw, kb = jax.random.split(key, 3)

    x = jax.random.normal(kx, (B, S, H), dtype=jnp.float32)
    # nn.LayerNorm defaults are ones/zeros; perturb slightly so the affine
    # path is actually exercised.
    weight = jnp.ones((H,), jnp.float32) + 0.1 * jax.random.normal(kw, (H,), jnp.float32)
    bias = 0.1 * jax.random.normal(kb, (H,), jnp.float32)

    out = layer_norm(x, weight, bias)
    jax.block_until_ready(out)

    # Reference check (pure JAX) to confirm semantics match nn.LayerNorm.
    mean = jnp.mean(x, axis=-1, keepdims=True)
    var = jnp.mean((x - mean) ** 2, axis=-1, keepdims=True)
    ref = (x - mean) * lax.rsqrt(var + EPS) * weight + bias
    assert jnp.allclose(out, ref, atol=1e-4, rtol=1e-4), "mismatch vs reference"

    print("KERNEL_OK")
</pallas_src>

<mosaic_0001>
module attributes {stable_mosaic.version = 11 : i64} {
  func.func @_layer_norm_kernel(%arg0: i32, %arg1: memref<32x128xf32, #tpu.memory_space<vmem>>, %arg2: memref<1x128xf32, #tpu.memory_space<vmem>>, %arg3: memref<1x128xf32, #tpu.memory_space<vmem>>, %arg4: memref<32x128xf32, #tpu.memory_space<vmem>>) attributes {dimension_semantics = [#tpu.dimension_semantics<parallel>], iteration_bounds = array<i64: 1>, scalar_prefetch = 0 : i64, scratch_operands = 0 : i64, tpu.core_type = #tpu.core_type<tc>, window_params = [{transform_indices = @transform_0, window_bounds = array<i64: 32, 128>}, {pipeline_mode = #tpu.pipeline_mode<synchronous>, transform_indices = @transform_1, window_bounds = array<i64: 1, 128>}, {pipeline_mode = #tpu.pipeline_mode<synchronous>, transform_indices = @transform_2, window_bounds = array<i64: 1, 128>}, {transform_indices = @transform_3, window_bounds = array<i64: 32, 128>}]} {
    %c0 = arith.constant 0 : index
    %c0_0 = arith.constant 0 : index
    %0 = vector.load %arg1[%c0, %c0_0] : memref<32x128xf32, #tpu.memory_space<vmem>>, vector<32x128xf32>
    %cst = arith.constant dense<0.000000e+00> : vector<32xf32>
    %1 = vector.multi_reduction <add>, %0, %cst [1] : vector<32x128xf32> to vector<32xf32>
    %2 = vector.shape_cast %1 : vector<32xf32> to vector<32x1xf32>
    %3 = arith.mulf %0, %0 : vector<32x128xf32>
    %cst_1 = arith.constant dense<0.000000e+00> : vector<32xf32>
    %4 = vector.multi_reduction <add>, %3, %cst_1 [1] : vector<32x128xf32> to vector<32xf32>
    %5 = vector.shape_cast %4 : vector<32xf32> to vector<32x1xf32>
    %cst_2 = arith.constant 7.812500e-03 : f32
    %6 = vector.broadcast %cst_2 : f32 to vector<32x1xf32>
    %7 = arith.mulf %2, %6 : vector<32x1xf32>
    %cst_3 = arith.constant 7.812500e-03 : f32
    %8 = vector.broadcast %cst_3 : f32 to vector<32x1xf32>
    %9 = arith.mulf %5, %8 : vector<32x1xf32>
    %10 = arith.mulf %7, %7 : vector<32x1xf32>
    %11 = arith.subf %9, %10 : vector<32x1xf32>
    %cst_4 = arith.constant 0.000000e+00 : f32
    %12 = vector.broadcast %cst_4 : f32 to vector<32x1xf32>
    %13 = arith.maximumf %11, %12 : vector<32x1xf32>
    %cst_5 = arith.constant 9.99999974E-6 : f32
    %14 = vector.broadcast %cst_5 : f32 to vector<32x1xf32>
    %15 = arith.addf %13, %14 : vector<32x1xf32>
    %16 = math.rsqrt %15 : vector<32x1xf32>
    %c0_6 = arith.constant 0 : index
    %c0_7 = arith.constant 0 : index
    %17 = vector.load %arg2[%c0_6, %c0_7] : memref<1x128xf32, #tpu.memory_space<vmem>>, vector<1x128xf32>
    %c0_8 = arith.constant 0 : index
    %c0_9 = arith.constant 0 : index
    %18 = vector.load %arg3[%c0_8, %c0_9] : memref<1x128xf32, #tpu.memory_space<vmem>>, vector<1x128xf32>
    %19 = vector.broadcast %7 : vector<32x1xf32> to vector<32x128xf32>
    %20 = arith.subf %0, %19 : vector<32x128xf32>
    %21 = vector.broadcast %16 : vector<32x1xf32> to vector<32x128xf32>
    %22 = arith.mulf %20, %21 : vector<32x128xf32>
    %23 = vector.broadcast %17 : vector<1x128xf32> to vector<32x128xf32>
    %24 = arith.mulf %22, %23 : vector<32x128xf32>
    %25 = vector.broadcast %18 : vector<1x128xf32> to vector<32x128xf32>
    %26 = arith.addf %24, %25 : vector<32x128xf32>
    %c0_10 = arith.constant 0 : index
    %c0_11 = arith.constant 0 : index
    %27 = vector.load %arg4[%c0_10, %c0_11] : memref<32x128xf32, #tpu.memory_space<vmem>>, vector<32x128xf32>
    tpu.vector_store %arg4[%c0_10, %c0_11], %26 {strides = array<i32>} : memref<32x128xf32, #tpu.memory_space<vmem>>, vector<32x128xf32>,
    return
  }
  func.func @transform_0(%arg0: i32) -> (i32, i32) {
    %c0_i32 = arith.constant 0 : i32
    %c0_i32_0 = arith.constant 0 : i32
    return %arg0, %c0_i32 : i32, i32
  }
  func.func @transform_1(%arg0: i32) -> (i32, i32) {
    %c0_i32 = arith.constant 0 : i32
    %c0_i32_0 = arith.constant 0 : i32
    %c0_i32_1 = arith.constant 0 : i32
    return %c0_i32, %c0_i32_0 : i32, i32
  }
  func.func @transform_2(%arg0: i32) -> (i32, i32) {
    %c0_i32 = arith.constant 0 : i32
    %c0_i32_0 = arith.constant 0 : i32
    %c0_i32_1 = arith.constant 0 : i32
    return %c0_i32, %c0_i32_0 : i32, i32
  }
  func.func @transform_3(%arg0: i32) -> (i32, i32) {
    %c0_i32 = arith.constant 0 : i32
    %c0_i32_0 = arith.constant 0 : i32
    return %arg0, %c0_i32 : i32, i32
  }
}

</mosaic_0001>

<bundles_post_ra>
// kernel: tpu_custom_call.1
= control target key start
LH: loop header
LB: loop body
LE: loop exit
PB: predicated region body
PF: predicated region fallthrough
CT: control target
= control target key end

     0   :  { %8 = vsyncpa [#allocation3], 0  ;;  %s266_s0 = inlined_call_operand.hbm [shape: f32[32,128], index: 0, kind: input, shape index: {}]   ;;  %s267_s1 = inlined_call_operand.vmem [shape: f32[1,128], index: 1, kind: input, shape index: {}]   ;;  %s268_s2 = inlined_call_operand.vmem [shape: f32[1,128], index: 2, kind: input, shape index: {}]   ;;  %s269_s3 = inlined_call_operand.hbm [shape: f32[32,128], index: 3, kind: output, shape index: {}]  }
   0x1   :  { %9 = vsyncpa [#allocation4], 0  ;;  %s194_s12 = smov [#allocation2]   ;;  %s146_s16 = scalar_lea.hbm %s266_s0, 512 }
   0x2   :  { %s15_s13 = sshll.u32 %s194_s12, 4  ;;  %p147_p0 = scmp.ne.s32.totalorder %s266_s0, %s146_s16  ;;  %s16_s13 = int_to_ptr.vmem [resolvable:$true] %s15_s13 }
   0x3   :  { %p150_p1 = scmp.lt.u32.totalorder %s146_s16, %s266_s0 }
   0x5   :  { %p152_p2 = pnand %p150_p1, %p147_p0 }
   0x7   :  { %155 = shalt.err (!%p152_p2)
}
   0x8   :  { %s156_s21 = scalar_lea.vmem %s16_s13, 512  ;;  %p161_p4 = scmp.lt.s32.totalorder %s16_s13, %s16_s13 }
   0x9   :  { %p157_p3 = scmp.ne.s32.totalorder %s16_s13, %s156_s21  ;;  %p162_p5 = scmp.lt.s32.totalorder %s156_s21, %s156_s21 }
   0xb   :  { %p163_p6 = por %p162_p5, %p161_p4 }
   0xd   :  { %p164_p7 = pnand %p163_p6, %p157_p3 }
   0xf   :  { %167 = shalt.err (!%p164_p7)
}
  0x10   :  { %s195_s22 = smov 128   ;;  %s196_s23 = smov 8  }
  0x11   :  { %21 = dma.hbm_to_vmem [thread:$0]  %s266_s0, 512, %s16_s13, [#allocation3], %s195_s22, %s195_s22, %s196_s23  }
  0x12   :  { %190 = dma.done.wait [#allocation3], 512  }
  0x13   :  { %191 = vsyncadd [#allocation3], 4294966784  ;;  %v233_v0 = vld [vmem:[#allocation2 + $0x10] sm:$0xff]  ;;  %v29_v1 = vld [vmem:[#allocation2] sm:$0xff] }
  0x14   :  { %37 = vadd.xlane.f32.xlu1 %v233_v0  ;;  %33 = vadd.xlane.f32.xlu0 %v29_v1  ;;  %v236_v2 = vld [vmem:[#allocation2 + $0x18] sm:$0xff]  ;;  %v30_v3 = vld [vmem:[#allocation2 + $0x8] sm:$0xff]  ;;  %v41_v5 = vmul.f32 %v29_v1, %v29_v1  ;;  %v43_v7 = vmul.f32 %v233_v0, %v233_v0  ;;  %v132_v43 = vld [vmem:[%s267_s1] ss:$0 sm:$0xff]  ;;  %s197_s1 = smov [#allocation5]  }
  0x15   :  { %v42_v4 = vmul.f32 %v30_v3, %v30_v3  ;;  %v44_v6 = vmul.f32 %v236_v2, %v236_v2  ;;  %v133_v46 = vld [vmem:[%s268_s2] ss:$0 sm:$0xff]  ;;  %s120_s29 = sshll.u32 %s197_s1, 4  ;;  %s121_s29 = int_to_ptr.vmem [resolvable:$true] %s120_s29 }
  0x16   :  { %s168_s2 = scalar_lea.vmem %s121_s29, 512  ;;  %p173_p9 = scmp.lt.s32.totalorder %s121_s29, %s121_s29 }
  0x17   :  { %p169_p8 = scmp.ne.s32.totalorder %s121_s29, %s168_s2  ;;  %p174_p10 = scmp.lt.s32.totalorder %s168_s2, %s168_s2 }
  0x18   :  { %39 = vadd.xlane.f32.xlu1 %v236_v2  ;;  %35 = vadd.xlane.f32.xlu0 %v30_v3 }
  0x19   :  { %p175_p11 = por %p174_p10, %p173_p9 }
  0x1b   :  { %p176_p12 = pnand %p175_p11, %p169_p8 }
  0x1c   :  { %47 = vadd.xlane.f32.xlu1 %v42_v4  ;;  %45 = vadd.xlane.f32.xlu0 %v41_v5 }
  0x20   :  { %51 = vadd.xlane.f32.xlu1 %v44_v6  ;;  %49 = vadd.xlane.f32.xlu0 %v43_v7 }
  0xa1   :  { %v38_v8 = vpop.xlane.xlu1 %37  ;;  %v34_v9 = vpop.xlane.xlu0 %33 }
  0xa2   :  { %v53_v12 = vmul.f32 0.0078125, %v34_v9  ;;  %v55_v14 = vmul.f32 0.0078125, %v38_v8 }
  0xa4   :  { %v61_v18 = vmul.f32 %v53_v12, %v53_v12  ;;  %v63_v24 = vmul.f32 %v55_v14, %v55_v14  ;;  %v83_v42 = vsub.f32 %v29_v1, %v53_v12  ;;  %v85_v51 = vsub.f32 %v233_v0, %v55_v14 }
  0xa5   :  { %v40_v10 = vpop.xlane.xlu1 %39  ;;  %v36_v11 = vpop.xlane.xlu0 %35 }
  0xa6   :  { %v54_v13 = vmul.f32 0.0078125, %v36_v11  ;;  %v56_v15 = vmul.f32 0.0078125, %v40_v10 }
  0xa8   :  { %v62_v19 = vmul.f32 %v54_v13, %v54_v13  ;;  %v64_v25 = vmul.f32 %v56_v15, %v56_v15  ;;  %v84_v40 = vsub.f32 %v30_v3, %v54_v13  ;;  %v86_v48 = vsub.f32 %v236_v2, %v56_v15 }
  0xa9   :  { %v48_v16 = vpop.xlane.xlu1 %47  ;;  %v46_v17 = vpop.xlane.xlu0 %45 }
  0xaa   :  { %v58_v20 = vmul.f32 0.0078125, %v48_v16  ;;  %v57_v21 = vmul.f32 0.0078125, %v46_v17 }
  0xac   :  { %v66_v22 = vsub.f32 %v58_v20, %v62_v19  ;;  %v65_v23 = vsub.f32 %v57_v21, %v61_v18 }
  0xad   :  { %v52_v26 = vpop.xlane.xlu1 %51  ;;  %v50_v27 = vpop.xlane.xlu0 %49 }
  0xae   :  { %v70_v28 = vmax.f32 %v66_v22, 0.0  ;;  %v69_v29 = vmax.f32 %v65_v23, 0.0  ;;  %v60_v30 = vmul.f32 0.0078125, %v52_v26  ;;  %v59_v31 = vmul.f32 0.0078125, %v50_v27 }
  0xb0   :  { %v74_v32 = vadd.f32 1e-05, %v70_v28  ;;  %v73_v33 = vadd.f32 1e-05, %v69_v29  ;;  %v68_v34 = vsub.f32 %v60_v30, %v64_v25  ;;  %v67_v35 = vsub.f32 %v59_v31, %v63_v24 }
  0xb2   :  { %138 = vrsqrt.f32 %v74_v32  ;;  %v72_v36 = vmax.f32 %v68_v34, 0.0  ;;  %v71_v37 = vmax.f32 %v67_v35, 0.0 }
  0xb3   :  { %140 = vrsqrt.f32 %v73_v33 }
  0xb4   :  { %v76_v38 = vadd.f32 1e-05, %v72_v36  ;;  %v75_v39 = vadd.f32 1e-05, %v71_v37 }
  0xb6   :  { %142 = vrsqrt.f32 %v76_v38 }
  0xb7   :  { %144 = vrsqrt.f32 %v75_v39 }
  0xbc   :  { %v139_v41 = vpop.eup %138 }
  0xbd   :  { %v141_v44 = vpop.eup %140  ;;  %v88_v45 = vmul.f32 %v139_v41, %v84_v40 }
  0xbe   :  { %v87_v47 = vmul.f32 %v141_v44, %v83_v42 }
  0xbf   :  { %v98_v49 = vmul.f32 %v132_v43, %v88_v45 }
  0xc0   :  { %v143_v50 = vpop.eup %142  ;;  %v97_v52 = vmul.f32 %v132_v43, %v87_v47 }
  0xc1   :  { %v145_v53 = vpop.eup %144  ;;  %v90_v54 = vmul.f32 %v143_v50, %v86_v48  ;;  %v108_v55 = vadd.f32 %v133_v46, %v98_v49 }
  0xc2   :  { %v89_v56 = vmul.f32 %v145_v53, %v85_v51  ;;  %v107_v57 = vadd.f32 %v133_v46, %v97_v52 }
  0xc3   :  { %v100_v58 = vmul.f32 %v132_v43, %v90_v54  ;;  %112 = vst [vmem:[#allocation5 + $0x8] sm:$0xff] %v108_v55 }
  0xc4   :  { %v99_v59 = vmul.f32 %v132_v43, %v89_v56  ;;  %111 = vst [vmem:[#allocation5] sm:$0xff] %v107_v57 }
  0xc5   :  { %v110_v60 = vadd.f32 %v133_v46, %v100_v58 }
  0xc6   :  { %v109_v61 = vadd.f32 %v133_v46, %v99_v59 }
  0xc7   :  { %114 = vst [vmem:[#allocation5 + $0x18] sm:$0xff] %v110_v60 }
  0xc8   :  { %113 = vst [vmem:[#allocation5 + $0x10] sm:$0xff] %v109_v61 }
  0xc9   :  { %179 = shalt.err (!%p176_p12)
}
  0xca   :  { %s180_s5 = scalar_lea.hbm %s269_s3, 512 }
  0xcb   :  { %p181_p13 = scmp.ne.s32.totalorder %s269_s3, %s180_s5  ;;  %p184_p0 = scmp.lt.u32.totalorder %s180_s5, %s269_s3 }
  0xcd   :  { %p186_p1 = pnand %p184_p0, %p181_p13 }
  0xcf   :  { %189 = shalt.err (!%p186_p1)
}
  0xd0   :  { %126 = dma.vmem_to_hbm [thread:$0]  %s121_s29, 512, %s269_s3, [#allocation4], %s195_s22, %s195_s22, %s196_s23  }
  0xd1   :  { %192 = dma.done.wait [#allocation4], 512  }
  0xd2   :  { %193 = vsyncadd [#allocation4], 4294966784 }
  0xd3   :  { %130 = vsyncpa [#allocation3], 1 }
  0xd4   :  { %131 = vsyncpa [#allocation4], 1 }

</bundles_post_ra>
